<compile_context>
chip_gen: v5e
topology: v5e:2x2
jax: 0.10.0
libtpu: 0.0.40
codegen_flags: <defaults>
</compile_context>

<pallas_src>
import functools

import jax
import jax.numpy as jnp
from jax.experimental import pallas as pl
from jax.experimental.pallas import tpu as pltpu


def _dino_loss_kernel(s_ref, t_ref, center_ref, loss_ref, tsum_ref,
                      *, inv_temp_s, inv_temp_t, n_rows, tile_rows):
    i = pl.program_id(0)
    s_raw = s_ref[...].astype(jnp.float32)        # [TM, D]
    t_raw = t_ref[...].astype(jnp.float32)        # [TM, D]
    center = center_ref[...].astype(jnp.float32)  # [1, D]

    # Teacher: center once, fold 1/temp_t into the exp argument (un-normalized
    # softmax; normalization is fused into the cross-entropy below).
    tc = t_raw - center                                          # [TM, D]
    t_max = jnp.max(tc, axis=-1, keepdims=True)                  # [TM, 1]
    t_exp = jnp.exp((tc - t_max) * inv_temp_t)                   # [TM, D]
    t_expsum = jnp.sum(t_exp, axis=-1, keepdims=True)            # [TM, 1]

    # Student: take the max on the raw logits (commutes with the positive
    # scale), so no separate scaled copy is materialized.
    s_max = jnp.max(s_raw, axis=-1, keepdims=True)               # [TM, 1]
    s_shift = (s_raw - s_max) * inv_temp_s                       # [TM, D]
    lse = jnp.log(jnp.sum(jnp.exp(s_shift), axis=-1, keepdims=True))

    # Fused cross-entropy:
    #   sum(-softmax(t) * log_softmax(s)) = lse - sum(t_exp*s_shift)/sum(t_exp)
    weighted = jnp.sum(t_exp * s_shift, axis=-1, keepdims=True)  # [TM, 1]
    loss_col = lse - weighted / t_expsum                         # exact divide
    # Lane-dense writeback: one column -> one lane-major row (XLU transpose).
    loss_ref[...] = loss_col.reshape(1, 1, tile_rows)

    # Per-tile column sum of the raw teacher output for the center update.
    # Mask the ragged tail of the last tile (rows >= N hold stale VMEM data).
    row = i * tile_rows + jax.lax.broadcasted_iota(jnp.int32, (tile_rows, 1), 0)
    t_valid = jnp.where(row < n_rows, t_raw, 0.0)
    d = t_raw.shape[-1]
    tsum_ref[...] = jnp.sum(t_valid, axis=0, keepdims=True).reshape(1, 1, d)


def _vmem_capacity_bytes():
    default = 128 * 1024 * 1024
    try:
        info = pltpu.get_tpu_info()
        cap = int(getattr(info, "vmem_capacity_bytes", default))
        if cap > 0:
            return cap
    except Exception:
        pass
    return default


def _plan_tiles(n, d, in_itemsize):
    """Pick (tile_rows, vmem_limit_bytes) with generation-aware budgeting."""
    cap = _vmem_capacity_bytes()
    # Scoped VMEM limit: leave headroom below physical capacity
    # (64 MiB physical on v7x -> ~48 MiB; 128 MiB on v5e/v6e -> 96 MiB).
    vmem_limit = max(32 * 1024 * 1024,
                     min(cap - 16 * 1024 * 1024, 96 * 1024 * 1024))
    budget = vmem_limit - 8 * 1024 * 1024
    # Per-row bytes: 2 logits inputs x 2 pipeline buffers (input dtype) plus
    # ~4 live [TM, D] f32 elementwise temporaries.
    per_row = 2 * 2 * d * in_itemsize + 4 * d * 4
    pack = max(8, 32 // in_itemsize)      # sublane packing: 8 f32 / 16 bf16
    tm = budget // per_row
    tm = max(pack, min(int(tm), 2048))
    tm = (tm // pack) * pack
    tm = min(tm, pl.cdiv(n, pack) * pack)  # never tile past the packed row count
    return tm, int(vmem_limit)


def dino_loss_pallas(output_s, output_t, mask, center,
                     temperature_s=0.1, temperature_t=0.04,
                     center_momentum=0.9):
    """Returns (scalar loss, updated center), mirroring DINOLoss.forward +
    update_center (single device; the dist.all_reduce is a no-op here)."""
    N, D = output_s.shape
    B = mask.shape[0]

    in_itemsize = max(jnp.dtype(output_s.dtype).itemsize,
                      jnp.dtype(output_t.dtype).itemsize)
    tm, vmem_limit = _plan_tiles(N, D, in_itemsize)
    num_tiles = pl.cdiv(N, tm)

    kernel = functools.partial(_dino_loss_kernel,
                               inv_temp_s=1.0 / float(temperature_s),
                               inv_temp_t=1.0 / float(temperature_t),
                               n_rows=N, tile_rows=tm)

    row_loss, t_partial = pl.pallas_call(
        kernel,
        out_shape=(
            jax.ShapeDtypeStruct((num_tiles, 1, tm), jnp.float32),
            jax.ShapeDtypeStruct((num_tiles, 1, D), jnp.float32),
        ),
        grid_spec=pltpu.PrefetchScalarGridSpec(
            num_scalar_prefetch=0,
            grid=(num_tiles,),
            in_specs=[
                pl.BlockSpec((tm, D), lambda i: (i, 0)),   # student tile
                pl.BlockSpec((tm, D), lambda i: (i, 0)),   # teacher tile
                pl.BlockSpec((1, D), lambda i: (0, 0)),    # center, resident
            ],
            out_specs=(
                pl.BlockSpec((1, 1, tm), lambda i: (i, 0, 0)),  # lane-dense loss
                pl.BlockSpec((1, 1, D), lambda i: (i, 0, 0)),   # per-tile colsum
            ),
        ),
        compiler_params=pltpu.CompilerParams(
            # Row-tile axis has no cross-tile dependence -> shardable across
            # TensorCores (v7x).
            dimension_semantics=("parallel",),
            vmem_limit_bytes=vmem_limit,
        ),
    )(output_s, output_t, center)

    # --- glue: (B, 1+T) reshape, masked combine, mean ---
    loss = row_loss.reshape(num_tiles * tm)[:N].reshape(B, -1)  # [B, 1+T]
    loss_cls = loss[:, 0]                                       # [B]
    loss_patch = loss[:, 1:]                                    # [B, T]
    mask_f = mask.astype(jnp.float32)
    loss_patch = (loss_patch * mask_f).sum(axis=1) / mask_f.sum(axis=1)
    total = (loss_patch + loss_cls).mean()

    # --- center EMA update ---
    # TODO(synk): dist.all_reduce of batch_center over devices omitted
    # (single-device run).
    batch_center = jnp.sum(t_partial.reshape(num_tiles, D), axis=0,
                           keepdims=True) / N
    new_center = center * center_momentum + batch_center * (1.0 - center_momentum)
    return total, new_center


def _reference(output_s, output_t, mask, center,
               temperature_s=0.1, temperature_t=0.04, center_momentum=0.9):
    out_s = output_s / temperature_s
    out_t = jax.nn.softmax((output_t - center) / temperature_t, axis=-1)
    loss = jnp.sum(-out_t * jax.nn.log_softmax(out_s, axis=-1), axis=-1)
    loss = loss.reshape(mask.shape[0], -1)
    loss_cls = loss[:, 0]
    loss_mask = loss[:, 1:]
    loss_mask = (loss_mask * mask).sum(axis=1) / mask.sum(axis=1)
    total = (loss_mask + loss_cls).mean()
    batch_center = jnp.sum(output_t, axis=0, keepdims=True) / output_t.shape[0]
    new_center = center * center_momentum + batch_center * (1 - center_momentum)
    return total, new_center


if __name__ == "__main__":
    key = jax.random.PRNGKey(0)
    B, T, D = 2, 8, 128          # batch, patch crops per sample, out_dim (lane-aligned)
    N = B * (1 + T)              # rows: [cls, patch_1..patch_T] per sample (N=18, ragged)

    k1, k2, k3 = jax.random.split(key, 3)
    output_s = jax.random.normal(k1, (N, D), dtype=jnp.float32)
    output_t = jax.random.normal(k2, (N, D), dtype=jnp.float32)
    mask = (jax.random.uniform(k3, (B, T)) > 0.3).astype(jnp.float32)
    mask = mask.at[:, 0].set(1.0)  # ensure mask.sum(1) > 0
    center = jnp.zeros((1, D), dtype=jnp.float32)

    loss, new_center = dino_loss_pallas(output_s, output_t, mask, center)
    loss = jax.block_until_ready(loss)
    new_center = jax.block_until_ready(new_center)

    ref_loss, ref_center = _reference(output_s, output_t, mask, center)
    assert jnp.allclose(loss, ref_loss, atol=5e-4, rtol=5e-4), (loss, ref_loss)
    assert jnp.allclose(new_center, ref_center, atol=1e-5, rtol=1e-5)

    print("KERNEL_OK")
</pallas_src>

<mosaic_0001>
module attributes {stable_mosaic.version = 11 : i64} {
  func.func @_dino_loss_kernel(%arg0: i32, %arg1: memref<24x128xf32, #tpu.memory_space<vmem>>, %arg2: memref<24x128xf32, #tpu.memory_space<vmem>>, %arg3: memref<1x128xf32, #tpu.memory_space<vmem>>, %arg4: memref<1x1x24xf32, #tpu.memory_space<vmem>>, %arg5: memref<1x1x128xf32, #tpu.memory_space<vmem>>) attributes {dimension_semantics = [#tpu.dimension_semantics<parallel>], iteration_bounds = array<i64: 1>, scalar_prefetch = 0 : i64, scratch_operands = 0 : i64, tpu.core_type = #tpu.core_type<tc>, window_params = [{transform_indices = @transform_0, window_bounds = array<i64: 24, 128>}, {transform_indices = @transform_1, window_bounds = array<i64: 24, 128>}, {pipeline_mode = #tpu.pipeline_mode<synchronous>, transform_indices = @transform_2, window_bounds = array<i64: 1, 128>}, {transform_indices = @transform_3, window_bounds = array<i64: 1, 1, 24>}, {transform_indices = @transform_4, window_bounds = array<i64: 1, 1, 128>}]} {
    %c0 = arith.constant 0 : index
    %c0_0 = arith.constant 0 : index
    %0 = vector.load %arg1[%c0, %c0_0] : memref<24x128xf32, #tpu.memory_space<vmem>>, vector<24x128xf32>
    %c0_1 = arith.constant 0 : index
    %c0_2 = arith.constant 0 : index
    %1 = vector.load %arg2[%c0_1, %c0_2] : memref<24x128xf32, #tpu.memory_space<vmem>>, vector<24x128xf32>
    %c0_3 = arith.constant 0 : index
    %c0_4 = arith.constant 0 : index
    %2 = vector.load %arg3[%c0_3, %c0_4] : memref<1x128xf32, #tpu.memory_space<vmem>>, vector<1x128xf32>
    %3 = vector.broadcast %2 : vector<1x128xf32> to vector<24x128xf32>
    %4 = arith.subf %1, %3 : vector<24x128xf32>
    %cst = arith.constant dense<0xFF800000> : vector<24xf32>
    %5 = vector.multi_reduction <maximumf>, %4, %cst [1] : vector<24x128xf32> to vector<24xf32>
    %6 = vector.shape_cast %5 : vector<24xf32> to vector<24x1xf32>
    %7 = vector.broadcast %6 : vector<24x1xf32> to vector<24x128xf32>
    %8 = arith.subf %4, %7 : vector<24x128xf32>
    %cst_5 = arith.constant 2.500000e+01 : f32
    %9 = vector.broadcast %cst_5 : f32 to vector<24x128xf32>
    %10 = arith.mulf %8, %9 : vector<24x128xf32>
    %11 = math.exp %10 : vector<24x128xf32>
    %cst_6 = arith.constant dense<0.000000e+00> : vector<24xf32>
    %12 = vector.multi_reduction <add>, %11, %cst_6 [1] : vector<24x128xf32> to vector<24xf32>
    %13 = vector.shape_cast %12 : vector<24xf32> to vector<24x1xf32>
    %cst_7 = arith.constant dense<0xFF800000> : vector<24xf32>
    %14 = vector.multi_reduction <maximumf>, %0, %cst_7 [1] : vector<24x128xf32> to vector<24xf32>
    %15 = vector.shape_cast %14 : vector<24xf32> to vector<24x1xf32>
    %16 = vector.broadcast %15 : vector<24x1xf32> to vector<24x128xf32>
    %17 = arith.subf %0, %16 : vector<24x128xf32>
    %cst_8 = arith.constant 1.000000e+01 : f32
    %18 = vector.broadcast %cst_8 : f32 to vector<24x128xf32>
    %19 = arith.mulf %17, %18 : vector<24x128xf32>
    %20 = math.exp %19 : vector<24x128xf32>
    %cst_9 = arith.constant dense<0.000000e+00> : vector<24xf32>
    %21 = vector.multi_reduction <add>, %20, %cst_9 [1] : vector<24x128xf32> to vector<24xf32>
    %22 = vector.shape_cast %21 : vector<24xf32> to vector<24x1xf32>
    %23 = math.log %22 : vector<24x1xf32>
    %24 = arith.mulf %11, %19 : vector<24x128xf32>
    %cst_10 = arith.constant dense<0.000000e+00> : vector<24xf32>
    %25 = vector.multi_reduction <add>, %24, %cst_10 [1] : vector<24x128xf32> to vector<24xf32>
    %26 = vector.shape_cast %25 : vector<24xf32> to vector<24x1xf32>
    %27 = arith.divf %26, %13 : vector<24x1xf32>
    %28 = arith.subf %23, %27 : vector<24x1xf32>
    %29 = vector.shape_cast %28 : vector<24x1xf32> to vector<1x1x24xf32>
    %c0_11 = arith.constant 0 : index
    %c0_12 = arith.constant 0 : index
    %c0_13 = arith.constant 0 : index
    %30 = vector.load %arg4[%c0_11, %c0_12, %c0_13] : memref<1x1x24xf32, #tpu.memory_space<vmem>>, vector<1x1x24xf32>
    tpu.vector_store %arg4[%c0_11, %c0_12, %c0_13], %29 {strides = array<i32>} : memref<1x1x24xf32, #tpu.memory_space<vmem>>, vector<1x1x24xf32>,
    %c24_i32 = arith.constant 24 : i32
    %31 = arith.muli %arg0, %c24_i32 : i32
    %32 = tpu.iota {dimensions = array<i32: 0>} : vector<24x1xi32>
    %33 = vector.broadcast %31 : i32 to vector<24x1xi32>
    %34 = arith.addi %33, %32 : vector<24x1xi32>
    %c18_i32 = arith.constant 18 : i32
    %35 = vector.broadcast %c18_i32 : i32 to vector<24x1xi32>
    %36 = arith.cmpi slt, %34, %35 : vector<24x1xi32>
    %cst_14 = arith.constant 0.000000e+00 : f32
    %37 = vector.shape_cast %36 : vector<24x1xi1> to vector<24x1xi1>
    %38 = vector.broadcast %37 : vector<24x1xi1> to vector<24x128xi1>
    %39 = vector.broadcast %cst_14 : f32 to vector<24x128xf32>
    %40 = arith.select %38, %1, %39 : vector<24x128xi1>, vector<24x128xf32>
    %cst_15 = arith.constant dense<0.000000e+00> : vector<128xf32>
    %41 = vector.multi_reduction <add>, %40, %cst_15 [0] : vector<24x128xf32> to vector<128xf32>
    %42 = vector.shape_cast %41 : vector<128xf32> to vector<1x128xf32>
    %43 = vector.shape_cast %42 : vector<1x128xf32> to vector<1x1x128xf32>
    %c0_16 = arith.constant 0 : index
    %c0_17 = arith.constant 0 : index
    %c0_18 = arith.constant 0 : index
    %44 = vector.load %arg5[%c0_16, %c0_17, %c0_18] : memref<1x1x128xf32, #tpu.memory_space<vmem>>, vector<1x1x128xf32>
    tpu.vector_store %arg5[%c0_16, %c0_17, %c0_18], %43 {strides = array<i32>} : memref<1x1x128xf32, #tpu.memory_space<vmem>>, vector<1x1x128xf32>,
    return
  }
  func.func @transform_0(%arg0: i32) -> (i32, i32) {
    %c0_i32 = arith.constant 0 : i32
    %c0_i32_0 = arith.constant 0 : i32
    return %arg0, %c0_i32 : i32, i32
  }
  func.func @transform_1(%arg0: i32) -> (i32, i32) {
    %c0_i32 = arith.constant 0 : i32
    %c0_i32_0 = arith.constant 0 : i32
    return %arg0, %c0_i32 : i32, i32
  }
  func.func @transform_2(%arg0: i32) -> (i32, i32) {
    %c0_i32 = arith.constant 0 : i32
    %c0_i32_0 = arith.constant 0 : i32
    %c0_i32_1 = arith.constant 0 : i32
    return %c0_i32, %c0_i32_0 : i32, i32
  }
  func.func @transform_3(%arg0: i32) -> (i32, i32, i32) {
    %c0_i32 = arith.constant 0 : i32
    %c0_i32_0 = arith.constant 0 : i32
    %c0_i32_1 = arith.constant 0 : i32
    return %arg0, %c0_i32, %c0_i32_0 : i32, i32, i32
  }
  func.func @transform_4(%arg0: i32) -> (i32, i32, i32) {
    %c0_i32 = arith.constant 0 : i32
    %c0_i32_0 = arith.constant 0 : i32
    %c0_i32_1 = arith.constant 0 : i32
    return %arg0, %c0_i32, %c0_i32_0 : i32, i32, i32
  }
}

</mosaic_0001>

<bundles_post_ra>
// kernel: tpu_custom_call.1
= control target key start
LH: loop header
LB: loop body
LE: loop exit
PB: predicated region body
PF: predicated region fallthrough
CT: control target
= control target key end

     0   :  { %10 = vsyncpa [#allocation3], 0  ;;  %s439_s0 = inlined_call_operand.hbm [shape: f32[18,128], index: 0, kind: input, shape index: {}]   ;;  %s440_s1 = inlined_call_operand.hbm [shape: f32[18,128], index: 1, kind: input, shape index: {}]   ;;  %s441_s2 = inlined_call_operand.vmem [shape: f32[1,128], index: 2, kind: input, shape index: {}]   ;;  %s442_s3 = inlined_call_operand.hbm [shape: f32[1,1,24], index: 3, kind: output, shape index: {0}]   ;;  %s443_s4 = inlined_call_operand.hbm [shape: f32[1,1,128], index: 4, kind: output, shape index: {1}]  }
   0x1   :  { %11 = vsyncpa [#allocation6], 0 }
   0x2   :  { %12 = vsyncpa [#allocation4], 0 }
   0x3   :  { %13 = vsyncpa [#allocation9], 0  ;;  %s18_s17 = sshll.u32 %s439_s0, 4  ;;  %s390_s18 = smov [#allocation2]   ;;  %s19_s17 = int_to_ptr.hbm [resolvable:$true] %s18_s17 }
   0x4   :  { %s20_s19 = sshll.u32 %s390_s18, 4  ;;  %s31_s22 = sshll.u32 %s440_s1, 4  ;;  %s21_s19 = int_to_ptr.vmem [resolvable:$true] %s20_s19  ;;  %s32_s22 = int_to_ptr.hbm [resolvable:$true] %s31_s22 }
   0x5   :  { %s391_s23 = smov 128   ;;  %s392_s24 = smov 8  }
   0x6   :  { %26 = dma.hbm_to_vmem [thread:$0]  %s19_s17, 384, %s21_s19, [#allocation3], %s391_s23, %s391_s23, %s392_s24  }
   0x7   :  { %s393_s25 = smov [#allocation5]  }
   0x8   :  { %s33_s26 = sshll.u32 %s393_s25, 4  ;;  %s34_s26 = int_to_ptr.vmem [resolvable:$true] %s33_s26 }
   0x9   :  { %39 = dma.hbm_to_vmem [thread:$0]  %s32_s22, 384, %s34_s26, [#allocation6], %s391_s23, %s391_s23, %s392_s24  }
   0xa   :  { %382 = dma.done.wait [#allocation3], 384  }
   0xb   :  { %383 = vsyncadd [#allocation3], 4294966912 }
   0xc   :  { %384 = dma.done.wait [#allocation6], 384  }
   0xd   :  { %385 = vsyncadd [#allocation6], 4294966912  ;;  %v177_v0 = vlaneseq  ;;  %v55_v3 = vld [vmem:[#allocation5 + $0x10] sm:$0xff]  ;;  %v261_v4 = vld [vmem:[%s441_s2] ss:$0 sm:$0xff]  ;;  %s394_s2 = smov [#allocation8]  }
   0xe   :  { %v53_v6 = vld [vmem:[#allocation5] sm:$0xff]  ;;  %v51_v7 = vld [vmem:[#allocation2 + $0x8] sm:$0xff]  ;;  %v54_v8 = vld [vmem:[#allocation5 + $0x8] sm:$0xff]  ;;  %v62_v9 = vsub.f32 %v55_v3, %v261_v4  ;;  %s237_s27 = sshll.u32 %s394_s2, 4  ;;  %s239_s30 = sshll.u32 %s443_s4, 4  ;;  %vm182_vm13 = vcmask 130112   ;;  %s238_s27 = int_to_ptr.vmem [resolvable:$true] %s237_s27  ;;  %s240_s30 = int_to_ptr.hbm [resolvable:$true] %s239_s30 }
   0xf   :  { %v193_v1 = vshrl.u32 %v177_v0, 7  ;;  %v60_v10 = vsub.f32 %v53_v6, %v261_v4  ;;  %89 = vmax.xlane.f32.xlu2 %v51_v7  ;;  %v212_v11 = vadd.f32 %v54_v8, %v53_v6  ;;  %v52_v13 = vld [vmem:[#allocation2 + $0x10] sm:$0xff]  ;;  %v61_v14 = vsub.f32 %v54_v8, %v261_v4  ;;  %v50_v15 = vld [vmem:[#allocation2] sm:$0xff]  ;;  %s395_s4 = smov [#allocation7]   ;;  %s228_s8 = sshll.u32 %s442_s3, 4  ;;  %s229_s8 = int_to_ptr.hbm [resolvable:$true] %s228_s8 }
  0x10   :  { %67 = vmax.xlane.f32.xlu1 %v62_v9  ;;  %s226_s5 = sshll.u32 %s395_s4, 4  ;;  %vm186_vm14 = vcmask 195712   ;;  %vm189_vm15 = vcmask 188416   ;;  %s227_s5 = int_to_ptr.vmem [resolvable:$true] %s226_s5 }
  0x11   :  { %v195_v2 = vadd.s32 16, %v193_v1  ;;  %63 = vmax.xlane.f32.xlu0 %v60_v10 }
  0x13   :  { %vm202_vm0 = vcmp.lt.s32.totalorder %v195_v2, 18 }
  0x14   :  { %v211_v5 = vsel %vm202_vm0, %v55_v3, 0.0 }
  0x15   :  { %v213_v12 = vadd.f32 %v212_v11, %v211_v5 }
  0x17   :  { %91 = vmax.xlane.f32.xlu2 %v52_v13  ;;  %v214_v49 = vrot.slane %v213_v12, 4 }
  0x18   :  { %87 = vmax.xlane.f32.xlu1 %v50_v15 }
  0x19   :  { %65 = vmax.xlane.f32.xlu0 %v61_v14  ;;  %v215_v50 = vadd.f32 %v214_v49, %v213_v12 }
  0x1b   :  { %v216_v51 = vrot.slane %v215_v50, 2 }
  0x1d   :  { %v217_v52 = vadd.f32 %v216_v51, %v215_v50 }
  0x1f   :  { %v218_v54 = vrot.slane %v217_v52, 1 }
  0x21   :  { %v219_v56 = vadd.f32 %v218_v54, %v217_v52 }
  0x23   :  { %220 = vst [vmem:[#allocation8] sm:$0x1] %v219_v56 }
  0x24   :  { %242 = dma.vmem_to_hbm [thread:$0]  %s238_s27, 16, %s240_s30, [#allocation9]  }
  0x82   :  { %v90_v16 = vpop.xlane.xlu2 %89 }
  0x83   :  { %v68_v17 = vpop.xlane.xlu1 %67  ;;  %v94_v32 = vsub.f32 %v51_v7, %v90_v16 }
  0x84   :  { %v64_v18 = vpop.xlane.xlu0 %63  ;;  %v71_v19 = vsub.f32 %v62_v9, %v68_v17 }
  0x85   :  { %v69_v20 = vsub.f32 %v60_v10, %v64_v18  ;;  %v97_v40 = vmul.f32 10.0, %v94_v32  ;;  %v178_v32 = vand.u32 127, %v177_v0 }
  0x86   :  { %v74_v21 = vmul.f32 25.0, %v71_v19 }
  0x87   :  { %v72_v22 = vmul.f32 25.0, %v69_v20  ;;  %v101_v42 = vmul.f32 1.442695, %v97_v40 }
  0x88   :  { %v79_v23 = vmul.f32 1.442695, %v74_v21 }
  0x89   :  { %v75_v24 = vmul.f32 1.442695, %v72_v22 }
  0x8a   :  { %v92_v25 = vpop.xlane.xlu2 %91  ;;  %262 = vpow2.f32 %v79_v23 }
  0x8b   :  { %v95_v26 = vsub.f32 %v52_v13, %v92_v25  ;;  %264 = vpow2.f32 %v75_v24  ;;  %v88_v28 = vpop.xlane.xlu1 %87 }
  0x8c   :  { %v66_v27 = vpop.xlane.xlu0 %65  ;;  %v93_v31 = vsub.f32 %v50_v15, %v88_v28 }
  0x8d   :  { %v70_v29 = vsub.f32 %v61_v14, %v66_v27  ;;  %v98_v30 = vmul.f32 10.0, %v95_v26 }
  0x8e   :  { %v96_v35 = vmul.f32 10.0, %v93_v31 }
  0x8f   :  { %v73_v33 = vmul.f32 25.0, %v70_v29  ;;  %v103_v34 = vmul.f32 1.442695, %v98_v30 }
  0x90   :  { %v263_v36 = vpop.eup %262  ;;  %v99_v38 = vmul.f32 1.442695, %v96_v35 }
  0x91   :  { %v77_v37 = vmul.f32 1.442695, %v73_v33  ;;  %266 = vpow2.f32 %v103_v34  ;;  %v265_v39 = vpop.eup %264  ;;  %85 = vadd.xlane.f32.xlu2 %v263_v36  ;;  %v119_v45 = vmul.f32 %v263_v36, %v98_v30 }
  0x92   :  { %81 = vadd.xlane.f32.xlu0 %v265_v39  ;;  %v117_v47 = vmul.f32 %v265_v39, %v96_v35 }
  0x93   :  { %268 = vpow2.f32 %v77_v37 }
  0x94   :  { %270 = vpow2.f32 %v99_v38 }
  0x95   :  { %272 = vpow2.f32 %v101_v42 }
  0x97   :  { %v267_v41 = vpop.eup %266 }
  0x99   :  { %v269_v43 = vpop.eup %268  ;;  %109 = vadd.xlane.f32.xlu2 %v267_v41  ;;  %v180_v41 = vadd.s32 4294967288, %v178_v32 }
  0x9a   :  { %v271_v44 = vpop.eup %270  ;;  %83 = vadd.xlane.f32.xlu1 %v269_v43  ;;  %v118_v48 = vmul.f32 %v269_v43, %v97_v40  ;;  %v184_v43 = vadd.s32 4294967280, %v178_v32 }
  0x9b   :  { %105 = vadd.xlane.f32.xlu0 %v271_v44  ;;  %v273_v46 = vpop.eup %272 }
  0xa1   :  { %124 = vadd.xlane.f32.xlu2 %v119_v45 }
  0xa2   :  { %107 = vadd.xlane.f32.xlu1 %v273_v46 }
  0xa3   :  { %120 = vadd.xlane.f32.xlu0 %v117_v47 }
  0xaa   :  { %122 = vadd.xlane.f32.xlu1 %v118_v48 }
 0x104   :  { %v86_v53 = vpop.xlane.xlu2 %85 }
 0x105   :  { %v82_v55 = vpop.xlane.xlu0 %81  ;;  %274 = vrcp.f32 %v86_v53  ;;  %vm161_vm1 = vweird.f32 %v86_v53  ;;  %v167_v8 = vand.u32 2147483648, %v86_v53  ;;  %v165_v12 = vand.u32 2147483647, %v86_v53 }
 0x106   :  { %276 = vrcp.f32 %v82_v55  ;;  %v137_v5 = vand.u32 2147483648, %v82_v55  ;;  %vm131_vm4 = vweird.f32 %v82_v55  ;;  %v135_v9 = vand.u32 2147483647, %v82_v55 }
 0x107   :  { %v168_v18 = vor.u32 1.1754944e-38, %v167_v8  ;;  %vm166_vm8 = vcmp.eq.f32.partialorder %v165_v12, 8.507059e+37 }
 0x108   :  { %v138_v16 = vor.u32 1.1754944e-38, %v137_v5  ;;  %vm136_vm7 = vcmp.eq.f32.partialorder %v135_v9, 8.507059e+37 }
 0x10b   :  { %v275_v57 = vpop.eup %274 }
 0x10c   :  { %v277_v58 = vpop.eup %276  ;;  %v157_v59 = vmul.f32 %v275_v57, %v86_v53  ;;  %v110_v2 = vpop.xlane.xlu2 %109  ;;  %vm162_vm3 = vweird.f32 %v275_v57 }
 0x10d   :  { %v84_v60 = vpop.xlane.xlu1 %83  ;;  %v127_v61 = vmul.f32 %v277_v58, %v82_v55  ;;  %vm132_vm2 = vweird.f32 %v277_v58  ;;  %vm163_vm6 = vmor %vm161_vm1, %vm162_vm3 }
 0x10e   :  { %v158_v62 = vsub.f32 1.0, %v157_v59  ;;  %v106_v1 = vpop.xlane.xlu0 %105  ;;  %278 = vrcp.f32 %v84_v60  ;;  %vm133_vm5 = vmor %vm131_vm4, %vm132_vm2  ;;  %v152_v22 = vand.u32 2147483648, %v84_v60  ;;  %v150_v27 = vand.u32 2147483647, %v84_v60 }
 0x10f   :  { %v128_v63 = vsub.f32 1.0, %v127_v61  ;;  %280 = vlog2.f32 %v106_v1  ;;  %vm146_vm10 = vweird.f32 %v84_v60 }
 0x110   :  { %v159_v3 = vmul.f32 %v275_v57, %v158_v62  ;;  %282 = vlog2.f32 %v110_v2  ;;  %v153_v35 = vor.u32 1.1754944e-38, %v152_v22  ;;  %vm151_vm12 = vcmp.eq.f32.partialorder %v150_v27, 8.507059e+37 }
 0x111   :  { %v129_v4 = vmul.f32 %v277_v58, %v128_v63 }
 0x112   :  { %v160_v6 = vadd.f32 %v275_v57, %v159_v3 }
 0x113   :  { %v130_v7 = vadd.f32 %v277_v58, %v129_v4 }
 0x114   :  { %v279_v11 = vpop.eup %278  ;;  %v164_v15 = vsel %vm163_vm6, %v275_v57, %v160_v6  ;;  %v125_v25 = vpop.xlane.xlu2 %124 }
 0x115   :  { %v108_v10 = vpop.xlane.xlu1 %107  ;;  %v142_v13 = vmul.f32 %v279_v11, %v84_v60  ;;  %v134_v14 = vsel %vm133_vm5, %v277_v58, %v130_v7  ;;  %v281_v19 = vpop.eup %280  ;;  %v169_v24 = vsel %vm166_vm8, %v168_v18, %v164_v15  ;;  %vm147_vm9 = vweird.f32 %v279_v11 }
 0x116   :  { %284 = vlog2.f32 %v108_v10  ;;  %v139_v20 = vsel %vm136_vm7, %v138_v16, %v134_v14  ;;  %v121_v21 = vpop.xlane.xlu0 %120  ;;  %v283_v23 = vpop.eup %282  ;;  %v112_v28 = vmul.f32 0.6931472, %v281_v19  ;;  %v170_v34 = vmul.f32 %v169_v24, %v125_v25  ;;  %vm148_vm11 = vmor %vm146_vm10, %vm147_vm9 }
 0x117   :  { %v143_v17 = vsub.f32 1.0, %v142_v13  ;;  %v140_v29 = vmul.f32 %v139_v20, %v121_v21  ;;  %v116_v33 = vmul.f32 0.6931472, %v283_v23 }
 0x119   :  { %v144_v26 = vmul.f32 %v279_v11, %v143_v17  ;;  %v171_v39 = vsub.f32 %v112_v28, %v140_v29  ;;  %v173_v44 = vsub.f32 %v116_v33, %v170_v34 }
 0x11b   :  { %v145_v30 = vadd.f32 %v279_v11, %v144_v26  ;;  %v179_v0 = vperm.slane %v171_v39, %v178_v32  ;;  %v185_v47 = vperm.slane %v173_v44, %v184_v43 }
 0x11c   :  { %v285_v31 = vpop.eup %284 }
 0x11d   :  { %v123_v36 = vpop.xlane.xlu1 %122  ;;  %v149_v37 = vsel %vm148_vm11, %v279_v11, %v145_v30  ;;  %v114_v40 = vmul.f32 0.6931472, %v285_v31 }
 0x11e   :  { %v154_v38 = vsel %vm151_vm12, %v153_v35, %v149_v37 }
 0x11f   :  { %v155_v42 = vmul.f32 %v154_v38, %v123_v36 }
 0x121   :  { %v172_v45 = vsub.f32 %v114_v40, %v155_v42 }
 0x123   :  { %v181_v46 = vperm.slane %v172_v45, %v180_v41 }
 0x125   :  { %v183_v48 = vsel %vm182_vm13, %v181_v46, %v179_v0 }
 0x126   :  { %v187_v49 = vsel %vm186_vm14, %v185_v47, %v183_v48 }
 0x127   :  { %190 = vst.msk [vmem:[#allocation7] sm:$0x1] %vm189_vm15, %v187_v49 }
 0x128   :  { %231 = dma.vmem_to_hbm [thread:$0]  %s227_s5, 16, %s229_s8, [#allocation4]  }
 0x129   :  { %386 = dma.done.wait [#allocation4], 16  }
 0x12a   :  { %387 = vsyncadd [#allocation4], 4294967280 }
 0x12b   :  { %388 = dma.done.wait [#allocation9], 16  }
 0x12c   :  { %389 = vsyncadd [#allocation9], 4294967280 }
 0x12d   :  { %251 = vsyncpa [#allocation3], 1 }
 0x12e   :  { %252 = vsyncpa [#allocation6], 1 }
 0x12f   :  { %253 = vsyncpa [#allocation4], 1 }
 0x130   :  { %254 = vsyncpa [#allocation9], 1 }

</bundles_post_ra>
